<compile_context>
chip_gen: v7x
topology: tpu7x:2x2x1
jax: 0.10.0
libtpu: 0.0.40
codegen_flags: <defaults>
</compile_context>

<pallas_src>
import math
import functools

import jax
import jax.numpy as jnp
from jax.experimental import pallas as pl
from jax.experimental.pallas import tpu as pltpu


# ----------------------------------------------------------------------------
# Parameter setup (replicates Filterbank.__init__, deterministic, no files)
# ----------------------------------------------------------------------------
def _to_mel(hz):
    return 2595.0 * math.log10(1.0 + hz / 700.0)


def make_filterbank_params(n_mels=40, f_min=0.0, f_max=8000.0, n_fft=400,
                           sample_rate=16000):
    n_stft = n_fft // 2 + 1
    mel = jnp.linspace(_to_mel(f_min), _to_mel(f_max), n_mels + 2,
                       dtype=jnp.float32)
    hz = 700.0 * (10.0 ** (mel / 2595.0) - 1.0)
    band = (hz[1:] - hz[:-1])[:-1]        # (n_mels,)
    f_central = hz[1:-1]                  # (n_mels,)
    all_freqs = jnp.linspace(0.0, sample_rate // 2, n_stft,
                             dtype=jnp.float32)   # (n_stft,)
    return f_central, band, all_freqs


def _make_fbank_matrix(f_central, band, all_freqs):
    """Triangular filterbank matrix (n_stft, n_mels).

    Mirrors Filterbank.forward for freeze=True / triangular / sort=False.
    NOTE: clamp constants are copied verbatim from the torch module (it clamps
    the Hz-scale params against fixed 0..0.5 / 3.1e-4..3.77e-2 bounds); the
    semantics of the given module are preserved exactly.
    """
    f_c = jnp.clip(f_central.astype(jnp.float32), 0.0, 0.5)
    bd = jnp.clip(band.astype(jnp.float32), 3.1 / 16000.0, 603.7 / 16000.0)
    slope = (all_freqs.astype(jnp.float32)[:, None] - f_c[None, :]) / bd[None, :]
    return jnp.maximum(0.0, jnp.minimum(slope + 1.0, 1.0 - slope))   # (F, M)


def _round_up(x, m):
    return ((x + m - 1) // m) * m


# ----------------------------------------------------------------------------
# Pallas kernel: matmul + amplitude->dB + per-tile max (single pass)
# ----------------------------------------------------------------------------
def _fbank_kernel(fb_ref, spec_ref, out_ref, max_ref, *,
                  multiplier, amin, db_offset, n_rows, row_tile):
    i = pl.program_id(0)

    # MXU matmul: (row_tile, F) @ (F, M) -> f32 accumulate.
    fbanks = jnp.dot(spec_ref[...], fb_ref[...],
                     preferred_element_type=jnp.float32)

    # amplitude -> dB (f32 math).
    x_db = multiplier * jnp.log10(jnp.maximum(fbanks, amin)) - db_offset
    out_ref[...] = x_db.astype(out_ref.dtype)

    # Per-tile max over valid rows only (mask out zero-padded rows).
    row = i * row_tile + jax.lax.broadcasted_iota(jnp.int32, x_db.shape, 0)
    masked = jnp.where(row < n_rows, x_db, -jnp.inf)
    max_ref[...] = jnp.full(max_ref.shape, jnp.max(masked), dtype=jnp.float32)


def _fbank_pallas_rows(spec2d, fb, *, multiplier, amin, db_offset, row_tile):
    rows, F = spec2d.shape
    M = fb.shape[1]

    tile = min(int(row_tile), _round_up(rows, 8))
    num_tiles = pl.cdiv(rows, tile)
    rows_pad = num_tiles * tile
    if rows_pad != rows:
        spec2d = jnp.pad(spec2d, ((0, rows_pad - rows), (0, 0)))

    kernel = functools.partial(
        _fbank_kernel,
        multiplier=float(multiplier), amin=float(amin),
        db_offset=float(db_offset), n_rows=rows, row_tile=tile)

    x_db, tile_max = pl.pallas_call(
        kernel,
        out_shape=(jax.ShapeDtypeStruct((rows_pad, M), spec2d.dtype),
                   jax.ShapeDtypeStruct((num_tiles * 8, 128), jnp.float32)),
        grid=(num_tiles,),
        in_specs=[
            pl.BlockSpec((F, M), lambda i: (0, 0)),        # filterbank (const)
            pl.BlockSpec((tile, F), lambda i: (i, 0)),     # spectrogram rows
        ],
        out_specs=(
            pl.BlockSpec((tile, M), lambda i: (i, 0)),     # x_db rows
            pl.BlockSpec((8, 128), lambda i: (i, 0)),      # per-tile max slab
        ),
        compiler_params=pltpu.CompilerParams(
            dimension_semantics=("parallel",),
            vmem_limit_bytes=32 * 1024 * 1024),
    )(fb, spec2d)

    return x_db[:rows], tile_max


def filterbank_forward(spectrogram, f_central, band, all_freqs, *,
                       multiplier=10.0, amin=1e-10, ref_value=1.0,
                       top_db=80.0, row_tile=512):
    """JAX/Pallas equivalent of Filterbank.forward (freeze=True, triangular,
    log_mel=True, sort=False, param_rand_factor=0)."""
    db_multiplier = math.log10(max(amin, ref_value))
    db_offset = float(multiplier) * float(db_multiplier)

    sp_shape = spectrogram.shape
    if len(sp_shape) == 4:
        # raw reshape, exactly matching torch's .reshape(B*C, T, F)
        spectrogram = spectrogram.reshape(
            sp_shape[0] * sp_shape[3], sp_shape[1], sp_shape[2])
    B, T, F = spectrogram.shape
    M = f_central.shape[0]

    # Filterbank matrix built outside the kernel (201x40 is trivial); cast to
    # the spectrogram dtype so bf16 inputs keep both MXU operands narrow.
    fb = _make_fbank_matrix(f_central, band, all_freqs).astype(spectrogram.dtype)

    spec2d = spectrogram.reshape(B * T, F)
    x_db, tile_max = _fbank_pallas_rows(
        spec2d, fb, multiplier=multiplier, amin=amin, db_offset=db_offset,
        row_tile=row_tile)

    # Global top_db floor: tiny reduce over per-tile maxes + fused elementwise.
    floor = jnp.max(tile_max) - top_db
    fbanks = jnp.maximum(x_db, floor.astype(x_db.dtype)).reshape(B, T, M)

    if len(sp_shape) == 4:
        fbanks = fbanks.reshape(sp_shape[0], T, M, sp_shape[3])
    return fbanks


# ----------------------------------------------------------------------------
# Pure-JAX reference (for correctness check)
# ----------------------------------------------------------------------------
def filterbank_reference(spectrogram, f_central, band, all_freqs, *,
                         multiplier=10.0, amin=1e-10, ref_value=1.0,
                         top_db=80.0):
    db_multiplier = math.log10(max(amin, ref_value))
    fb = _make_fbank_matrix(f_central, band, all_freqs)
    fbanks = jnp.matmul(spectrogram, fb)
    x_db = multiplier * jnp.log10(jnp.maximum(fbanks, amin))
    x_db = x_db - multiplier * db_multiplier
    x_db = jnp.maximum(x_db, jnp.max(x_db) - top_db)
    return x_db


# ----------------------------------------------------------------------------
# Main
# ----------------------------------------------------------------------------
if __name__ == "__main__":
    # Module defaults: n_mels=40, n_fft=400 -> n_stft=201, sample_rate=16000.
    n_mels, n_fft, sample_rate = 40, 400, 16000
    n_stft = n_fft // 2 + 1

    f_central, band, all_freqs = make_filterbank_params(
        n_mels=n_mels, f_min=0.0, f_max=8000.0, n_fft=n_fft,
        sample_rate=sample_rate)

    # Small deterministic input: [batch=2, time=8, n_stft=201]
    key = jax.random.PRNGKey(0)
    spec = jax.random.uniform(key, (2, 8, n_stft), dtype=jnp.float32,
                              minval=0.0, maxval=4.0)

    out = filterbank_forward(spec, f_central, band, all_freqs)
    out = jax.block_until_ready(out)

    ref = filterbank_reference(spec, f_central, band, all_freqs)
    assert out.shape == (2, 8, n_mels), out.shape
    assert jnp.allclose(out, ref, atol=1e-4, rtol=1e-4), (
        float(jnp.max(jnp.abs(out - ref))))

    # TODO(synk): sort=True / freeze=False / param_rand_factor training-time
    # random perturbation and rectangular/gaussian filter shapes are not
    # exercised (module defaults used).
    print("KERNEL_OK")
</pallas_src>

<mosaic_0001>
module attributes {stable_mosaic.version = 11 : i64} {
  func.func @_fbank_kernel(%arg0: i32, %arg1: memref<201x40xf32, #tpu.memory_space<vmem>>, %arg2: memref<16x201xf32, #tpu.memory_space<vmem>>, %arg3: memref<16x40xf32, #tpu.memory_space<vmem>>, %arg4: memref<8x128xf32, #tpu.memory_space<vmem>>) attributes {dimension_semantics = [#tpu.dimension_semantics<parallel>], iteration_bounds = array<i64: 1>, scalar_prefetch = 0 : i64, scratch_operands = 0 : i64, tpu.core_type = #tpu.core_type<tc>, window_params = [{pipeline_mode = #tpu.pipeline_mode<synchronous>, transform_indices = @transform_0, window_bounds = array<i64: 201, 40>}, {transform_indices = @transform_1, window_bounds = array<i64: 16, 201>}, {transform_indices = @transform_2, window_bounds = array<i64: 16, 40>}, {transform_indices = @transform_3, window_bounds = array<i64: 8, 128>}]} {
    %c0 = arith.constant 0 : index
    %c0_0 = arith.constant 0 : index
    %0 = vector.load %arg2[%c0, %c0_0] : memref<16x201xf32, #tpu.memory_space<vmem>>, vector<16x201xf32>
    %c0_1 = arith.constant 0 : index
    %c0_2 = arith.constant 0 : index
    %1 = vector.load %arg1[%c0_1, %c0_2] : memref<201x40xf32, #tpu.memory_space<vmem>>, vector<201x40xf32>
    %cst = arith.constant dense<0.000000e+00> : vector<16x40xf32>
    %2 = tpu.matmul %0, %1, %cst {dimension_numbers = #tpu.dot_dimension_numbers<[1], [0], [0], [1], [0, 0, 1, 1], [], []>} : vector<16x201xf32>, vector<201x40xf32>, vector<16x40xf32> -> vector<16x40xf32>
    %cst_3 = arith.constant 1.000000e-10 : f32
    %3 = vector.broadcast %cst_3 : f32 to vector<16x40xf32>
    %4 = arith.maximumf %2, %3 : vector<16x40xf32>
    %5 = math.log %4 : vector<16x40xf32>
    %cst_4 = arith.constant 0.434294492 : f32
    %6 = vector.broadcast %cst_4 : f32 to vector<16x40xf32>
    %7 = arith.mulf %5, %6 : vector<16x40xf32>
    %cst_5 = arith.constant 1.000000e+01 : f32
    %8 = vector.broadcast %cst_5 : f32 to vector<16x40xf32>
    %9 = arith.mulf %8, %7 : vector<16x40xf32>
    %cst_6 = arith.constant 0.000000e+00 : f32
    %10 = vector.broadcast %cst_6 : f32 to vector<16x40xf32>
    %11 = arith.subf %9, %10 : vector<16x40xf32>
    %c0_7 = arith.constant 0 : index
    %c0_8 = arith.constant 0 : index
    %12 = vector.load %arg3[%c0_7, %c0_8] : memref<16x40xf32, #tpu.memory_space<vmem>>, vector<16x40xf32>
    tpu.vector_store %arg3[%c0_7, %c0_8], %11 {strides = array<i32>} : memref<16x40xf32, #tpu.memory_space<vmem>>, vector<16x40xf32>,
    %c16_i32 = arith.constant 16 : i32
    %13 = arith.muli %arg0, %c16_i32 : i32
    %14 = tpu.iota {dimensions = array<i32: 0>} : vector<16x40xi32>
    %15 = vector.broadcast %13 : i32 to vector<16x40xi32>
    %16 = arith.addi %15, %14 : vector<16x40xi32>
    %c16_i32_9 = arith.constant 16 : i32
    %17 = vector.broadcast %c16_i32_9 : i32 to vector<16x40xi32>
    %18 = arith.cmpi slt, %16, %17 : vector<16x40xi32>
    %cst_10 = arith.constant 0xFF800000 : f32
    %19 = vector.broadcast %cst_10 : f32 to vector<16x40xf32>
    %20 = arith.select %18, %11, %19 : vector<16x40xi1>, vector<16x40xf32>
    %21 = vector.shape_cast %20 : vector<16x40xf32> to vector<1x16x40xf32>
    %cst_11 = arith.constant dense<0xFF800000> : vector<1xf32>
    %22 = vector.multi_reduction <maximumf>, %21, %cst_11 [1, 2] : vector<1x16x40xf32> to vector<1xf32>
    %23 = vector.shape_cast %22 : vector<1xf32> to vector<1x1x1xf32>
    %24 = vector.extract %23[0, 0, 0] : f32 from vector<1x1x1xf32>
    %25 = vector.broadcast %24 : f32 to vector<8x128xf32>
    %c0_12 = arith.constant 0 : index
    %c0_13 = arith.constant 0 : index
    %26 = vector.load %arg4[%c0_12, %c0_13] : memref<8x128xf32, #tpu.memory_space<vmem>>, vector<8x128xf32>
    tpu.vector_store %arg4[%c0_12, %c0_13], %25 {strides = array<i32>} : memref<8x128xf32, #tpu.memory_space<vmem>>, vector<8x128xf32>,
    return
  }
  func.func @transform_0(%arg0: i32) -> (i32, i32) {
    %c0_i32 = arith.constant 0 : i32
    %c0_i32_0 = arith.constant 0 : i32
    %c0_i32_1 = arith.constant 0 : i32
    return %c0_i32, %c0_i32_0 : i32, i32
  }
  func.func @transform_1(%arg0: i32) -> (i32, i32) {
    %c0_i32 = arith.constant 0 : i32
    %c0_i32_0 = arith.constant 0 : i32
    return %arg0, %c0_i32 : i32, i32
  }
  func.func @transform_2(%arg0: i32) -> (i32, i32) {
    %c0_i32 = arith.constant 0 : i32
    %c0_i32_0 = arith.constant 0 : i32
    return %arg0, %c0_i32 : i32, i32
  }
  func.func @transform_3(%arg0: i32) -> (i32, i32) {
    %c0_i32 = arith.constant 0 : i32
    %c0_i32_0 = arith.constant 0 : i32
    return %arg0, %c0_i32 : i32, i32
  }
}

</mosaic_0001>

<bundles_post_ra>
// kernel: tpu_custom_call.1
= control target key start
LH: loop header
LB: loop body
LE: loop exit
PB: predicated region body
PF: predicated region fallthrough
CT: control target
= control target key end

     0   :  { %9 = vsyncpa [#allocation3], 0  ;;  %v328_v3 = vmov 0.0|0.0   ;;  %vm45_vm0 = vcmask 596992   ;;  %s494_s0 = inlined_call_operand.vmem [shape: f32[201,40], index: 0, kind: input, shape index: {}]   ;;  %s495_s1 = inlined_call_operand.vmem [shape: f32[16,201], index: 1, kind: input, shape index: {}]   ;;  %s496_s2 = inlined_call_operand.hbm [shape: f32[16,40], index: 2, kind: output, shape index: {0}]   ;;  %s497_s3 = inlined_call_operand.hbm [shape: f32[8,128], index: 3, kind: output, shape index: {1}]  }
   0x1   :  { %v19_v0 = vld [vmem:[%s494_s0] sm:$0xff]  ;;  %v20_v1 = vld [vmem:[%s494_s0 + $0x8] sm:$0xff]  ;;  %v21_v2 = vld [vmem:[%s494_s0 + $0x10] sm:$0xff]  ;;  %202 = vmatprep.subr.bf16.mxu0 %v328_v3  ;;  %242 = vmatprep.subr.bf16.mxu1 %v328_v3 }
   0x2   :  { %v203_v4 = vpack.c.bf16 %v20_v1, %v19_v0  ;;  %v22_v5 = vld [vmem:[%s494_s0 + $0x18] sm:$0xff]  ;;  %v23_v7 = vld [vmem:[%s494_s0 + $0x20] sm:$0xff]  ;;  %v24_v8 = vld [vmem:[%s494_s0 + $0x28] sm:$0xff] }
   0x3   :  { %v206_v6 = vpack.c.bf16 %v22_v5, %v21_v2  ;;  %v209_v9 = vpack.c.bf16 %v24_v8, %v23_v7  ;;  %v25_v10 = vld [vmem:[%s494_s0 + $0x30] sm:$0xff]  ;;  %v26_v11 = vld [vmem:[%s494_s0 + $0x38] sm:$0xff]  ;;  %v16_v12 = vld [vmem:[%s495_s1 + $0x8] sm:$0xff] }
   0x4   :  { %204 = vmatpush1.bf16.msra.mxu0 %v203_v4  ;;  %255 = vmatpush1.bf16.msra.mxu1 %v203_v4  ;;  %v18_v13 = vld [vmem:[%s495_s1 + $0x18] sm:$0xff] }
   0x5   :  { %205 = vmatprep.subr.bf16.mxu0 %v328_v3  ;;  %243 = vmatprep.subr.bf16.mxu1 %v328_v3 }
   0x6   :  { %200 = vmatprep.mubr.msk.f32.mxu0 %vm45_vm0, %v16_v12  ;;  %201 = vmatprep.mubr.msk.f32.mxu1 %vm45_vm0, %v18_v13 }
   0x8   :  { %207 = vmatpush1.bf16.msra.mxu0 %v206_v6  ;;  %256 = vmatpush1.bf16.msra.mxu1 %v206_v6 }
   0x9   :  { %208 = vmatprep.subr.bf16.mxu0 %v328_v3  ;;  %244 = vmatprep.subr.bf16.mxu1 %v328_v3 }
   0xa   :  { %10 = vsyncpa [#allocation5], 0  ;;  %v212_v14 = vpack.c.bf16 %v26_v11, %v25_v10  ;;  %v27_v15 = vld [vmem:[%s494_s0 + $0x40] sm:$0xff]  ;;  %v28_v16 = vld [vmem:[%s494_s0 + $0x48] sm:$0xff]  ;;  %vm52_vm1 = vcmask 1040384   ;;  %vm329_vm2 = vmmov 1  }
   0xb   :  { %v215_v17 = vpack.c.bf16 %v28_v16, %v27_v15  ;;  %v29_v18 = vld [vmem:[%s494_s0 + $0x50] sm:$0xff]  ;;  %v30_v19 = vld [vmem:[%s494_s0 + $0x58] sm:$0xff]  ;;  %v31_v21 = vld [vmem:[%s494_s0 + $0x60] sm:$0xff]  ;;  %vm141_vm4 = vcmask 326656  }
   0xc   :  { %210 = vmatpush1.bf16.msra.mxu0 %v209_v9  ;;  %257 = vmatpush1.bf16.msra.mxu1 %v209_v9  ;;  %v218_v20 = vpack.c.bf16 %v30_v19, %v29_v18  ;;  %v32_v22 = vld [vmem:[%s494_s0 + $0x68] sm:$0xff]  ;;  %v33_v24 = vld [vmem:[%s494_s0 + $0x70] sm:$0xff]  ;;  %v34_v25 = vld [vmem:[%s494_s0 + $0x78] sm:$0xff] }
   0xd   :  { %211 = vmatprep.subr.bf16.mxu0 %v328_v3  ;;  %245 = vmatprep.subr.bf16.mxu1 %v328_v3  ;;  %v221_v23 = vpack.c.bf16 %v32_v22, %v31_v21  ;;  %v224_v26 = vpack.c.bf16 %v34_v25, %v33_v24  ;;  %v35_v27 = vld [vmem:[%s494_s0 + $0x80] sm:$0xff]  ;;  %v36_v28 = vld [vmem:[%s494_s0 + $0x88] sm:$0xff]  ;;  %v37_v30 = vld [vmem:[%s494_s0 + $0x90] sm:$0xff] }
   0xe   :  { %v227_v29 = vpack.c.bf16 %v36_v28, %v35_v27  ;;  %v38_v31 = vld [vmem:[%s494_s0 + $0x98] sm:$0xff]  ;;  %v39_v33 = vld [vmem:[%s494_s0 + $0xa0] sm:$0xff]  ;;  %v40_v34 = vld [vmem:[%s494_s0 + $0xa8] sm:$0xff] }
   0xf   :  { %v230_v32 = vpack.c.bf16 %v38_v31, %v37_v30  ;;  %v233_v35 = vpack.c.bf16 %v40_v34, %v39_v33  ;;  %v41_v36 = vld [vmem:[%s494_s0 + $0xb0] sm:$0xff]  ;;  %v42_v37 = vld [vmem:[%s494_s0 + $0xb8] sm:$0xff]  ;;  %v43_v39 = vld [vmem:[%s494_s0 + $0xc0] sm:$0xff] }
  0x10   :  { %213 = vmatpush1.bf16.msra.mxu0 %v212_v14  ;;  %258 = vmatpush1.bf16.msra.mxu1 %v212_v14  ;;  %v236_v38 = vpack.c.bf16 %v42_v37, %v41_v36  ;;  %v44_v40 = vld [vmem:[%s494_s0 + $0xc8] sm:$0x1]  ;;  %vm240_vm3 = vmpackc.low %vm52_vm1, %vm329_vm2  ;;  %v15_v42 = vld [vmem:[%s495_s1] sm:$0xff]  ;;  %s330_s0 = smov [#allocation2]  }
  0x11   :  { %214 = vmatprep.subr.bf16.mxu0 %v328_v3  ;;  %246 = vmatprep.subr.bf16.mxu1 %v328_v3  ;;  %v239_v41 = vpack.c.bf16 %v44_v40, %v43_v39  ;;  %v17_v43 = vld [vmem:[%s495_s1 + $0x10] sm:$0xff]  ;;  %s174_s1 = sshll.u32 %s330_s0, 4  ;;  %s175_s1 = int_to_ptr.vmem [resolvable:$true] %s174_s1 }
  0x12   :  { %s280_s18 = scalar_lea.vmem %s175_s1, 256  ;;  %p285_p1 = scmp.lt.s32.totalorder %s175_s1, %s175_s1 }
  0x13   :  { %p281_p0 = scmp.ne.s32.totalorder %s175_s1, %s280_s18  ;;  %p286_p2 = scmp.lt.s32.totalorder %s280_s18, %s280_s18 }
  0x14   :  { %216 = vmatpush1.bf16.msra.mxu0 %v215_v17  ;;  %259 = vmatpush1.bf16.msra.mxu1 %v215_v17 }
  0x15   :  { %217 = vmatprep.subr.bf16.mxu0 %v328_v3  ;;  %247 = vmatprep.subr.bf16.mxu1 %v328_v3  ;;  %p287_p3 = por %p286_p2, %p285_p1 }
  0x17   :  { %p288_p4 = pnand %p287_p3, %p281_p0 }
  0x18   :  { %219 = vmatpush1.bf16.msra.mxu0 %v218_v20  ;;  %260 = vmatpush1.bf16.msra.mxu1 %v218_v20 }
  0x19   :  { %220 = vmatprep.subr.bf16.mxu0 %v328_v3  ;;  %248 = vmatprep.subr.bf16.mxu1 %v328_v3 }
  0x1c   :  { %222 = vmatpush1.bf16.msra.mxu0 %v221_v23  ;;  %261 = vmatpush1.bf16.msra.mxu1 %v221_v23 }
  0x1d   :  { %223 = vmatprep.subr.bf16.mxu0 %v328_v3  ;;  %249 = vmatprep.subr.bf16.mxu1 %v328_v3 }
  0x20   :  { %225 = vmatpush1.bf16.msra.mxu0 %v224_v26  ;;  %262 = vmatpush1.bf16.msra.mxu1 %v224_v26 }
  0x21   :  { %226 = vmatprep.subr.bf16.mxu0 %v328_v3  ;;  %250 = vmatprep.subr.bf16.mxu1 %v328_v3 }
  0x24   :  { %228 = vmatpush1.bf16.msra.mxu0 %v227_v29  ;;  %263 = vmatpush1.bf16.msra.mxu1 %v227_v29 }
  0x25   :  { %229 = vmatprep.subr.bf16.mxu0 %v328_v3  ;;  %251 = vmatprep.subr.bf16.mxu1 %v328_v3 }
  0x28   :  { %231 = vmatpush1.bf16.msra.mxu0 %v230_v32  ;;  %264 = vmatpush1.bf16.msra.mxu1 %v230_v32 }
  0x29   :  { %232 = vmatprep.subr.bf16.mxu0 %v328_v3  ;;  %252 = vmatprep.subr.bf16.mxu1 %v328_v3 }
  0x2c   :  { %234 = vmatpush1.bf16.msra.mxu0 %v233_v35  ;;  %265 = vmatpush1.bf16.msra.mxu1 %v233_v35 }
  0x2d   :  { %235 = vmatprep.subr.bf16.mxu0 %v328_v3  ;;  %253 = vmatprep.subr.bf16.mxu1 %v328_v3 }
  0x30   :  { %237 = vmatpush1.bf16.msra.mxu0 %v236_v38  ;;  %266 = vmatpush1.bf16.msra.mxu1 %v236_v38 }
  0x31   :  { %238 = vmatprep.subr.bf16.mxu0 %v328_v3  ;;  %254 = vmatprep.subr.bf16.mxu1 %v328_v3 }
  0x34   :  { %241 = vmatpush1.bf16.msk.msra.mxu0 %vm240_vm3, %v239_v41  ;;  %267 = vmatpush1.bf16.msk.msra.mxu1 %vm240_vm3, %v239_v41 }
  0x37   :  { %121 = vmatmul.mubr.f32.vlgmr.msra.gmra.mrb[0].mxu0 %v15_v42  ;;  %126 = vmatmul.mubr.f32.vlgmr.msra.gmra.mrb[0].mxu1 %v17_v43 }
 0x10a   :  { %v122_v44 = vpop.f32.mrb[0].mxu0  ;;  %v127_v45 = vpop.f32.mrb[0].mxu1 }
 0x10b   :  { %v131_v46 = vmax.f32 %v122_v44, 1e-10  ;;  %v132_v47 = vmax.f32 %v127_v45, 1e-10  ;;  %v124_v48 = vpop.f32.mrb[1].mxu0  ;;  %v129_v49 = vpop.f32.mrb[1].mxu1 }
 0x10d   :  { %276 = vlog2.f32 %v131_v46 }
 0x10e   :  { %278 = vlog2.f32 %v132_v47 }
 0x117   :  { %v277_v50 = vpop.eup %276 }
 0x118   :  { %v279_v51 = vpop.eup %278  ;;  %v134_v52 = vmul.f32 0.6931472, %v277_v50 }
 0x119   :  { %v136_v53 = vmul.f32 0.6931472, %v279_v51 }
 0x11a   :  { %v137_v54 = vmul.f32 0.4342945, %v134_v52 }
 0x11b   :  { %v138_v55 = vmul.f32 0.4342945, %v136_v53 }
 0x11c   :  { %v139_v56 = vmul.f32 10.0, %v137_v54 }
 0x11d   :  { %v140_v57 = vmul.f32 10.0, %v138_v55 }
 0x11e   :  { %142 = vst.msk [vmem:[#allocation2] sm:$0xff] %vm141_vm4, %v139_v56  ;;  %v155_v58 = vsel %vm141_vm4, %v139_v56, -inf }
 0x11f   :  { %143 = vst.msk [vmem:[#allocation2 + $0x8] sm:$0xff] %vm141_vm4, %v140_v57  ;;  %v156_v59 = vsel %vm141_vm4, %v140_v57, -inf }
 0x120   :  { %v157_v60 = vmax.f32 %v155_v58, %v156_v59 }
 0x122   :  { %158 = vmax.xlane.f32.xlu0 %v157_v60 }
 0x123   :  { %291 = shalt.err (!%p288_p4)
}
 0x124   :  { %s292_s21 = scalar_lea.hbm %s496_s2, 256 }
 0x125   :  { %p293_p5 = scmp.ne.s32.totalorder %s496_s2, %s292_s21  ;;  %p296_p6 = scmp.lt.u32.totalorder %s292_s21, %s496_s2 }
 0x127   :  { %p298_p7 = pnand %p296_p6, %p293_p5 }
 0x129   :  { %301 = shalt.err (!%p298_p7)
}
 0x12a   :  { %s331_s26 = smov 128   ;;  %s332_s27 = smov 8  }
 0x12b   :  { %180 = dma.vmem_to_hbm [thread:$0]  %s175_s1, 256, %s496_s2, [#allocation3], %s331_s26, %s331_s26, %s332_s27  }
 0x12c   :  { %s333_s30 = smov [#allocation4]  }
 0x12d   :  { %s187_s4 = sshll.u32 %s333_s30, 4  ;;  %s188_s4 = int_to_ptr.vmem [resolvable:$true] %s187_s4 }
 0x12e   :  { %s302_s6 = scalar_lea.vmem %s188_s4, 128  ;;  %p307_p9 = scmp.lt.s32.totalorder %s188_s4, %s188_s4 }
 0x12f   :  { %p303_p8 = scmp.ne.s32.totalorder %s188_s4, %s302_s6  ;;  %p308_p10 = scmp.lt.s32.totalorder %s302_s6, %s302_s6 }
 0x131   :  { %p309_p11 = por %p308_p10, %p307_p9 }
 0x133   :  { %p310_p12 = pnand %p309_p11, %p303_p8 }
 0x1af   :  { %v159_v61 = vpop.xlane.xlu0 %158 }
 0x1b0   :  { %v160_v62 = vrot.slane %v159_v61, 4 }
 0x1b2   :  { %v161_v63 = vmax.f32 %v159_v61, %v160_v62 }
 0x1b4   :  { %v162_v0 = vrot.slane %v161_v63, 2 }
 0x1b6   :  { %v163_v1 = vmax.f32 %v161_v63, %v162_v0 }
 0x1b8   :  { %v164_v2 = vrot.slane %v163_v1, 1 }
 0x1ba   :  { %v165_v3 = vmax.f32 %v163_v1, %v164_v2 }
 0x1bc   :  { %268 = vpush %v165_v3 }
 0x1ed   :  { %s269_s5 = spop %268 }
 0x1ee   :  { %v167_v4 = vstv %s269_s5 }
 0x1ef   :  { %168 = vst [vmem:[#allocation4] sm:$0xff] %v167_v4 }
 0x1f0   :  { %313 = shalt.err (!%p310_p12)
}
 0x1f1   :  { %s314_s8 = scalar_lea.hbm %s497_s3, 128 }
 0x1f2   :  { %p315_p13 = scmp.ne.s32.totalorder %s497_s3, %s314_s8  ;;  %p318_p0 = scmp.lt.u32.totalorder %s314_s8, %s497_s3 }
 0x1f4   :  { %p320_p1 = pnand %p318_p0, %p315_p13 }
 0x1f6   :  { %323 = shalt.err (!%p320_p1)
}
 0x1f7   :  { %190 = dma.vmem_to_hbm [thread:$0]  %s188_s4, 128, %s497_s3, [#allocation5]  }
 0x1f8   :  { %324 = dma.done.wait [#allocation3], 256  }
 0x1f9   :  { %325 = vsyncadd [#allocation3], 4294967040 }
 0x1fa   :  { %326 = dma.done.wait [#allocation5], 128  }
 0x1fb   :  { %327 = vsyncadd [#allocation5], 4294967168 }
 0x1fc   :  { %197 = vsyncpa [#allocation3], 1 }
 0x1fd   :  { %198 = vsyncpa [#allocation5], 1 }

</bundles_post_ra>
